<compile_context>
chip_gen: v7x
topology: tpu7x:2x2x1
jax: 0.10.0
libtpu: 0.0.40
codegen_flags: <defaults>
</compile_context>

<pallas_src>
import jax
import jax.numpy as jnp
from jax import lax
from jax.experimental import pallas as pl
from jax.experimental.pallas import tpu as pltpu


_LANE = 128
_SUBLANE = 8


def _round_up(x: int, m: int) -> int:
    return ((x + m - 1) // m) * m


def _lane_pad(n: int) -> int:
    return _round_up(max(int(n), 1), _LANE)


def _sub_pad(n: int) -> int:
    return _round_up(max(int(n), 1), _SUBLANE)


def _tpu_kind() -> str:
    try:
        return jax.devices()[0].device_kind.lower()
    except Exception:  # pragma: no cover
        return ""


def _default_core_splits() -> int:
    """2 TensorCores per chip on v4 / v5p / v7x; 1 on v5e / v6e."""
    kind = _tpu_kind()
    if "v7" in kind or "v4" in kind:
        return 2
    if "v5" in kind and "lite" not in kind and "v5e" not in kind:
        return 2  # v5p megacore
    return 1


def _vmem_budget_bytes() -> int:
    """Per-TensorCore scoped-VMEM budget, generation-aware."""
    kind = _tpu_kind()
    if "v7" in kind:
        return 40 * 1024 * 1024      # 64 MiB physical per TC -> leave headroom
    return 96 * 1024 * 1024          # v5e / v6e: 128 MiB physical


def _make_readout_kernel(num_layers: int, num_graphs_padded: int,
                         tile_nodes: int, compute_dtype):
    """Kernel body for a fixed (static) configuration."""

    def kernel(x_ref, bid_ref, *refs):
        # refs = (w1, b1, ..., wL, bL, out_ref)
        out_ref = refs[-1]                  # (B_pad, H) f32, resident acc
        param_refs = refs[:-1]

        # Zero the accumulator at the first node tile of this core-split.
        @pl.when(pl.program_id(1) == 0)
        def _init():
            out_ref[...] = jnp.zeros_like(out_ref)

        # --- MLP over the node tile (MXU matmuls, f32 bias+ReLU on VPU) ---
        # Cast to the MXU compute dtype in-kernel (hidden under the DMA).
        h = x_ref[...].astype(compute_dtype)            # (TILE_N, F)
        for i in range(num_layers):
            w = param_refs[2 * i][...]                  # (in, out) compute
            b = param_refs[2 * i + 1][...]              # (1, out)  f32
            h = jnp.dot(h, w, preferred_element_type=jnp.float32)
            h = jnp.maximum(h + b, 0.0)                 # bias + ReLU in f32
            h = h.astype(compute_dtype)                 # back to MXU dtype

        # --- Segment-sum via one-hot matmul (ids are lane-major) ---
        ids = bid_ref[...]                              # (1, TILE_N) int32
        giota = lax.broadcasted_iota(
            jnp.int32, (num_graphs_padded, tile_nodes), 0)
        onehot = jnp.where(giota == ids, 1.0, 0.0).astype(compute_dtype)
        out_ref[...] += jnp.dot(onehot, h, preferred_element_type=jnp.float32)

    return kernel


def readout_layer_pallas(node_features, batch_vector, params, num_graphs, *,
                         tile_nodes: int = 8192, num_core_splits=None,
                         compute_dtype=jnp.bfloat16,
                         target_tiles_per_split: int = 4):
    """ReadoutLayer forward as a node-tiled, pipelined Pallas TPU kernel.

    Args:
      node_features: (N, F) float array.
      batch_vector:  (N,)   int graph index per node.
      params: dict with 'mlp' = [(W_in_out, b), ...] and 'out' = (W_in_out, b),
              weights stored as (in_features, out_features).
      num_graphs: static int B (== batch_vector.max() + 1).
      num_core_splits: None -> auto (2 only on 2-TensorCore chips).
    Returns:
      (B, n_out_features) float32.
    """
    N, F = node_features.shape
    num_layers = len(params["mlp"])
    wo, bo = params["out"]
    H = params["mlp"][-1][0].shape[1]          # hidden width of the MLP
    n_out = wo.shape[1]

    if num_core_splits is None:
        num_core_splits = _default_core_splits()
    num_core_splits = max(int(num_core_splits), 1)

    B_pad = _round_up(max(num_graphs, 1), 8)
    itemsize = jnp.dtype(compute_dtype).itemsize

    # --- Parameters: weights in compute dtype, biases in f32 (1, out) ---
    flat = []
    for w, b in params["mlp"]:
        flat.append(w.astype(compute_dtype))
        flat.append(b.astype(jnp.float32).reshape(1, -1))
    param_vmem = sum(_sub_pad(a.shape[0]) * _lane_pad(a.shape[1])
                     * a.dtype.itemsize for a in flat)

    # --- Tile sizing -------------------------------------------------------
    # Big tiles amortize the ~0.35us/step grid overhead; cap by N so small
    # inputs do not explode padding, and by the VMEM budget (accounting for
    # Mosaic lane padding of the narrow F / H blocks).
    hidden_dims = [F] + [w.shape[1] for w, _ in params["mlp"]]
    tile_req = _round_up(max(int(tile_nodes), 128), 128)
    tile_cap = _round_up(
        -(-N // (num_core_splits * max(int(target_tiles_per_split), 1))), 128)
    tile_nodes = max(128, min(tile_req, tile_cap))

    def per_step_vmem(t):
        x_b = t * _lane_pad(F) * 4                       # f32 x block
        bid_b = _SUBLANE * t * 4                         # (1, t) int32 block
        acc_b = _sub_pad(B_pad) * _lane_pad(H) * 4       # resident accumulator
        h_b = t * max(_lane_pad(d) for d in hidden_dims) * (4 + itemsize)
        onehot_b = _sub_pad(B_pad) * t * (4 + itemsize)
        # x / bid / params / acc are double-buffered by the pipeline.
        return 2 * (x_b + bid_b + param_vmem + acc_b) + h_b + onehot_b

    vmem_budget = _vmem_budget_bytes()
    while tile_nodes > 128 and per_step_vmem(tile_nodes) > 0.6 * vmem_budget:
        tile_nodes = max(128, _round_up(tile_nodes // 2, 128))

    span = tile_nodes * num_core_splits
    N_pad = _round_up(max(N, 1), span)
    tiles_per_split = N_pad // span

    # --- Inputs: x stays f32 (cast happens in-kernel); pad ragged tail only -
    x = node_features
    bid = batch_vector.astype(jnp.int32)
    if N_pad != N:
        x = jnp.pad(x, ((0, N_pad - N), (0, 0)))
        bid = jnp.pad(bid, (0, N_pad - N), constant_values=-1)  # never matches
    bid = bid.reshape(1, N_pad)

    inputs = [x, bid] + flat

    # --- BlockSpecs ---
    def x_map(c, n):
        return (c * tiles_per_split + n, 0)

    def bid_map(c, n):
        return (0, c * tiles_per_split + n)

    def const_map(c, n):
        return (0, 0)

    in_specs = [
        pl.BlockSpec((tile_nodes, F), x_map),
        pl.BlockSpec((1, tile_nodes), bid_map),
    ]
    for arr in flat:
        in_specs.append(pl.BlockSpec(arr.shape, const_map))  # stays resident

    out_spec = pl.BlockSpec((None, B_pad, H), lambda c, n: (c, 0, 0))

    # --- Cost estimate ---
    mlp_flops = sum(2 * N_pad * hidden_dims[i] * hidden_dims[i + 1]
                    for i in range(num_layers))
    seg_flops = 2 * N_pad * B_pad * H
    param_bytes = sum(int(a.size) * a.dtype.itemsize for a in flat)
    bytes_accessed = (int(x.size) * x.dtype.itemsize + int(bid.size) * 4
                      + param_bytes + num_core_splits * B_pad * H * 4)
    cost = pl.CostEstimate(flops=int(mlp_flops + seg_flops),
                           transcendentals=0,
                           bytes_accessed=int(bytes_accessed))

    kernel = _make_readout_kernel(num_layers, B_pad, tile_nodes, compute_dtype)

    partials = pl.pallas_call(
        kernel,
        out_shape=jax.ShapeDtypeStruct(
            (num_core_splits, B_pad, H), jnp.float32),
        grid=(num_core_splits, tiles_per_split),
        in_specs=in_specs,
        out_specs=out_spec,
        compiler_params=pltpu.CompilerParams(
            dimension_semantics=("parallel", "arbitrary"),
            vmem_limit_bytes=int(vmem_budget),
        ),
        cost_estimate=cost,
    )(*inputs)

    # Combine per-core partial segment sums, then the (tiny) output Linear in
    # f32 in the wrapper (un-folded tail), dropping the graph padding.
    emb = partials.sum(axis=0)[:num_graphs, :]                 # (B, H) f32
    out = emb @ wo.astype(jnp.float32) + bo.astype(jnp.float32).reshape(1, -1)
    return out


def readout_layer_reference(node_features, batch_vector, params, num_graphs):
    """Pure-JAX f32 reference matching the PyTorch forward (eval mode)."""
    h = node_features.astype(jnp.float32)
    for w, b in params["mlp"]:
        h = jnp.maximum(h @ w + b, 0.0)
    emb = jax.ops.segment_sum(h, batch_vector, num_segments=num_graphs)
    wo, bo = params["out"]
    return emb @ wo + bo


def readout_layer_reference_cast(node_features, batch_vector, params,
                                 num_graphs, compute_dtype):
    """Reference that applies the same reduced-precision casts as the kernel."""
    h = node_features.astype(compute_dtype)
    for w, b in params["mlp"]:
        pre = jnp.dot(h, w.astype(compute_dtype),
                      preferred_element_type=jnp.float32)
        h = jnp.maximum(pre + b.astype(jnp.float32), 0.0).astype(compute_dtype)
    emb = jax.ops.segment_sum(h.astype(jnp.float32), batch_vector,
                              num_segments=num_graphs)
    wo, bo = params["out"]
    return emb @ wo.astype(jnp.float32) + bo.astype(jnp.float32)


if __name__ == "__main__":
    # Small shapes consistent with the module's forward; N chosen so the grid
    # exercises node padding and multiple node tiles per split.
    N = 500                # total nodes in the batch
    F_NODE = 16            # n_node_features
    H = 32                 # n_hidden_features
    N_OUT = 8              # n_out_features
    NUM_LAYERS = 2
    B = 5                  # number of graphs in the batch

    key = jax.random.PRNGKey(0)
    k_x, k_perm, k_w1, k_b1, k_w2, k_b2, k_wo, k_bo = jax.random.split(key, 8)

    node_features = jax.random.normal(k_x, (N, F_NODE), dtype=jnp.float32)
    # Every graph index 0..B-1 appears; deterministic shuffle of arange % B.
    batch_vector = jax.random.permutation(
        k_perm, jnp.arange(N, dtype=jnp.int32) % B)

    # Deterministic parameter init (weights stored as (in, out)).
    def init_linear(kw, kb, fan_in, fan_out):
        bound = 1.0 / jnp.sqrt(jnp.float32(fan_in))
        w = jax.random.uniform(kw, (fan_in, fan_out), jnp.float32, -bound, bound)
        b = jax.random.uniform(kb, (fan_out,), jnp.float32, -bound, bound)
        return w, b

    params = {
        "mlp": [
            init_linear(k_w1, k_b1, F_NODE, H),
            init_linear(k_w2, k_b2, H, H),
        ][:NUM_LAYERS],
        "out": init_linear(k_wo, k_bo, H, N_OUT),
    }

    ref = readout_layer_reference(node_features, batch_vector, params, B)

    # --- f32 MXU path, generation-auto core split: check vs pure reference ---
    out_f32 = readout_layer_pallas(
        node_features, batch_vector, params, B,
        num_core_splits=None, compute_dtype=jnp.float32)
    out_f32 = jax.block_until_ready(out_f32)
    assert out_f32.shape == (B, N_OUT)
    assert jnp.allclose(out_f32, ref, atol=1e-2, rtol=1e-2), (out_f32, ref)

    # --- bf16 MXU path, explicit 2-way split: check vs cast-matching ref ---
    out_bf16 = readout_layer_pallas(
        node_features, batch_vector, params, B,
        num_core_splits=2, compute_dtype=jnp.bfloat16)
    out_bf16 = jax.block_until_ready(out_bf16)
    ref_bf16 = readout_layer_reference_cast(
        node_features, batch_vector, params, B, jnp.bfloat16)
    assert out_bf16.shape == (B, N_OUT)
    assert jnp.allclose(out_bf16, ref_bf16, atol=1e-2, rtol=1e-2), (
        out_bf16, ref_bf16)

    print("KERNEL_OK")
</pallas_src>

<mosaic_0001>
module attributes {stable_mosaic.version = 11 : i64} {
  func.func @kernel(%arg0: i32, %arg1: i32, %arg2: memref<128x16xf32, #tpu.memory_space<vmem>>, %arg3: memref<1x128xi32, #tpu.memory_space<vmem>>, %arg4: memref<16x32xf32, #tpu.memory_space<vmem>>, %arg5: memref<1x32xf32, #tpu.memory_space<vmem>>, %arg6: memref<32x32xf32, #tpu.memory_space<vmem>>, %arg7: memref<1x32xf32, #tpu.memory_space<vmem>>, %arg8: memref<1x8x32xf32, #tpu.memory_space<vmem>>) attributes {dimension_semantics = [#tpu.dimension_semantics<parallel>, #tpu.dimension_semantics<arbitrary>], iteration_bounds = array<i64: 1, 4>, scalar_prefetch = 0 : i64, scratch_operands = 0 : i64, tpu.core_type = #tpu.core_type<tc>, window_params = [{transform_indices = @transform_0, window_bounds = array<i64: 128, 16>}, {transform_indices = @transform_1, window_bounds = array<i64: 1, 128>}, {pipeline_mode = #tpu.pipeline_mode<synchronous>, transform_indices = @transform_2, window_bounds = array<i64: 16, 32>}, {pipeline_mode = #tpu.pipeline_mode<synchronous>, transform_indices = @transform_3, window_bounds = array<i64: 1, 32>}, {pipeline_mode = #tpu.pipeline_mode<synchronous>, transform_indices = @transform_4, window_bounds = array<i64: 32, 32>}, {pipeline_mode = #tpu.pipeline_mode<synchronous>, transform_indices = @transform_5, window_bounds = array<i64: 1, 32>}, {transform_indices = @transform_6, window_bounds = array<i64: 1, 8, 32>}]} {
    %c0_i32 = arith.constant 0 : i32
    %0 = arith.cmpi eq, %arg1, %c0_i32 : i32
    %1 = arith.extui %0 : i1 to i32
    %c0_i32_0 = arith.constant 0 : i32
    %2 = arith.cmpi ne, %1, %c0_i32_0 : i32
    scf.if %2 {
      %cst_24 = arith.constant 0.000000e+00 : f32
      %32 = vector.broadcast %cst_24 : f32 to vector<8x32xf32>
      %c0_25 = arith.constant 0 : index
      %c0_26 = arith.constant 0 : index
      %c0_27 = arith.constant 0 : index
      %33 = vector.load %arg8[%c0_25, %c0_26, %c0_27] : memref<1x8x32xf32, #tpu.memory_space<vmem>>, vector<1x8x32xf32>
      %34 = vector.shape_cast %33 : vector<1x8x32xf32> to vector<8x32xf32>
      %35 = vector.shape_cast %32 : vector<8x32xf32> to vector<1x8x32xf32>
      tpu.vector_store %arg8[%c0_25, %c0_26, %c0_27], %35 {strides = array<i32>} : memref<1x8x32xf32, #tpu.memory_space<vmem>>, vector<1x8x32xf32>,
    } else {
    }
    %c0 = arith.constant 0 : index
    %c0_1 = arith.constant 0 : index
    %3 = vector.load %arg2[%c0, %c0_1] : memref<128x16xf32, #tpu.memory_space<vmem>>, vector<128x16xf32>
    %c0_2 = arith.constant 0 : index
    %c0_3 = arith.constant 0 : index
    %4 = vector.load %arg4[%c0_2, %c0_3] : memref<16x32xf32, #tpu.memory_space<vmem>>, vector<16x32xf32>
    %c0_4 = arith.constant 0 : index
    %c0_5 = arith.constant 0 : index
    %5 = vector.load %arg5[%c0_4, %c0_5] : memref<1x32xf32, #tpu.memory_space<vmem>>, vector<1x32xf32>
    %cst = arith.constant dense<0.000000e+00> : vector<128x32xf32>
    %6 = tpu.matmul %3, %4, %cst {dimension_numbers = #tpu.dot_dimension_numbers<[1], [0], [0], [1], [0, 0, 1, 1], [], []>} : vector<128x16xf32>, vector<16x32xf32>, vector<128x32xf32> -> vector<128x32xf32>
    %7 = vector.broadcast %5 : vector<1x32xf32> to vector<128x32xf32>
    %8 = arith.addf %6, %7 : vector<128x32xf32>
    %cst_6 = arith.constant 0.000000e+00 : f32
    %9 = vector.broadcast %cst_6 : f32 to vector<128x32xf32>
    %10 = arith.maximumf %8, %9 : vector<128x32xf32>
    %c0_7 = arith.constant 0 : index
    %c0_8 = arith.constant 0 : index
    %11 = vector.load %arg6[%c0_7, %c0_8] : memref<32x32xf32, #tpu.memory_space<vmem>>, vector<32x32xf32>
    %c0_9 = arith.constant 0 : index
    %c0_10 = arith.constant 0 : index
    %12 = vector.load %arg7[%c0_9, %c0_10] : memref<1x32xf32, #tpu.memory_space<vmem>>, vector<1x32xf32>
    %cst_11 = arith.constant dense<0.000000e+00> : vector<128x32xf32>
    %13 = tpu.matmul %10, %11, %cst_11 {dimension_numbers = #tpu.dot_dimension_numbers<[1], [0], [0], [1], [0, 0, 1, 1], [], []>} : vector<128x32xf32>, vector<32x32xf32>, vector<128x32xf32> -> vector<128x32xf32>
    %14 = vector.broadcast %12 : vector<1x32xf32> to vector<128x32xf32>
    %15 = arith.addf %13, %14 : vector<128x32xf32>
    %cst_12 = arith.constant 0.000000e+00 : f32
    %16 = vector.broadcast %cst_12 : f32 to vector<128x32xf32>
    %17 = arith.maximumf %15, %16 : vector<128x32xf32>
    %c0_13 = arith.constant 0 : index
    %c0_14 = arith.constant 0 : index
    %18 = vector.load %arg3[%c0_13, %c0_14] : memref<1x128xi32, #tpu.memory_space<vmem>>, vector<1x128xi32>
    %19 = tpu.iota {dimensions = array<i32: 0>} : vector<8x128xi32>
    %20 = vector.broadcast %18 : vector<1x128xi32> to vector<8x128xi32>
    %21 = arith.cmpi eq, %19, %20 : vector<8x128xi32>
    %cst_15 = arith.constant 1.000000e+00 : f32
    %cst_16 = arith.constant 0.000000e+00 : f32
    %22 = vector.broadcast %cst_15 : f32 to vector<8x128xf32>
    %23 = vector.broadcast %cst_16 : f32 to vector<8x128xf32>
    %24 = arith.select %21, %22, %23 : vector<8x128xi1>, vector<8x128xf32>
    %c0_17 = arith.constant 0 : index
    %c0_18 = arith.constant 0 : index
    %c0_19 = arith.constant 0 : index
    %25 = vector.load %arg8[%c0_17, %c0_18, %c0_19] : memref<1x8x32xf32, #tpu.memory_space<vmem>>, vector<1x8x32xf32>
    %26 = vector.shape_cast %25 : vector<1x8x32xf32> to vector<8x32xf32>
    %cst_20 = arith.constant dense<0.000000e+00> : vector<8x32xf32>
    %27 = tpu.matmul %24, %17, %cst_20 {dimension_numbers = #tpu.dot_dimension_numbers<[1], [0], [0], [1], [0, 0, 1, 1], [], []>} : vector<8x128xf32>, vector<128x32xf32>, vector<8x32xf32> -> vector<8x32xf32>
    %28 = arith.addf %26, %27 : vector<8x32xf32>
    %c0_21 = arith.constant 0 : index
    %c0_22 = arith.constant 0 : index
    %c0_23 = arith.constant 0 : index
    %29 = vector.load %arg8[%c0_21, %c0_22, %c0_23] : memref<1x8x32xf32, #tpu.memory_space<vmem>>, vector<1x8x32xf32>
    %30 = vector.shape_cast %29 : vector<1x8x32xf32> to vector<8x32xf32>
    %31 = vector.shape_cast %28 : vector<8x32xf32> to vector<1x8x32xf32>
    tpu.vector_store %arg8[%c0_21, %c0_22, %c0_23], %31 {strides = array<i32>} : memref<1x8x32xf32, #tpu.memory_space<vmem>>, vector<1x8x32xf32>,
    return
  }
  func.func @transform_0(%arg0: i32, %arg1: i32) -> (i32, i32) {
    %c4_i32 = arith.constant 4 : i32
    %0 = arith.muli %arg0, %c4_i32 : i32
    %1 = arith.addi %0, %arg1 : i32
    %c0_i32 = arith.constant 0 : i32
    %c0_i32_0 = arith.constant 0 : i32
    return %1, %c0_i32 : i32, i32
  }
  func.func @transform_1(%arg0: i32, %arg1: i32) -> (i32, i32) {
    %c4_i32 = arith.constant 4 : i32
    %0 = arith.muli %arg0, %c4_i32 : i32
    %1 = arith.addi %0, %arg1 : i32
    %c0_i32 = arith.constant 0 : i32
    %c0_i32_0 = arith.constant 0 : i32
    return %c0_i32, %1 : i32, i32
  }
  func.func @transform_2(%arg0: i32, %arg1: i32) -> (i32, i32) {
    %c0_i32 = arith.constant 0 : i32
    %c0_i32_0 = arith.constant 0 : i32
    %c0_i32_1 = arith.constant 0 : i32
    return %c0_i32, %c0_i32_0 : i32, i32
  }
  func.func @transform_3(%arg0: i32, %arg1: i32) -> (i32, i32) {
    %c0_i32 = arith.constant 0 : i32
    %c0_i32_0 = arith.constant 0 : i32
    %c0_i32_1 = arith.constant 0 : i32
    return %c0_i32, %c0_i32_0 : i32, i32
  }
  func.func @transform_4(%arg0: i32, %arg1: i32) -> (i32, i32) {
    %c0_i32 = arith.constant 0 : i32
    %c0_i32_0 = arith.constant 0 : i32
    %c0_i32_1 = arith.constant 0 : i32
    return %c0_i32, %c0_i32_0 : i32, i32
  }
  func.func @transform_5(%arg0: i32, %arg1: i32) -> (i32, i32) {
    %c0_i32 = arith.constant 0 : i32
    %c0_i32_0 = arith.constant 0 : i32
    %c0_i32_1 = arith.constant 0 : i32
    return %c0_i32, %c0_i32_0 : i32, i32
  }
  func.func @transform_6(%arg0: i32, %arg1: i32) -> (i32, i32, i32) {
    %c0_i32 = arith.constant 0 : i32
    %c0_i32_0 = arith.constant 0 : i32
    %c0_i32_1 = arith.constant 0 : i32
    return %arg0, %c0_i32, %c0_i32_0 : i32, i32, i32
  }
}

</mosaic_0001>

<bundles_post_ra>
// kernel: tpu_custom_call.1
= control target key start
LH: loop header
LB: loop body
LE: loop exit
PB: predicated region body
PF: predicated region fallthrough
CT: control target
= control target key end

     0   :  { %s2131_s0 = inlined_call_operand.hbm [shape: f32[512,16], index: 0, kind: input, shape index: {}]   ;;  %s2132_s1 = inlined_call_operand.hbm [shape: s32[1,512], index: 1, kind: input, shape index: {}]   ;;  %s2133_s2 = inlined_call_operand.hbm [shape: f32[16,32], index: 2, kind: input, shape index: {}]   ;;  %s2134_s3 = inlined_call_operand.hbm [shape: f32[1,32], index: 3, kind: input, shape index: {}]   ;;  %s2135_s4 = inlined_call_operand.hbm [shape: f32[32,32], index: 4, kind: input, shape index: {}]   ;;  %s2136_s5 = inlined_call_operand.hbm [shape: f32[1,32], index: 5, kind: input, shape index: {}]   ;;  %s2137_s6 = inlined_call_operand.hbm [shape: f32[1,8,32], index: 6, kind: output, shape index: {}]  }
   0x1   :  { %2141 = sst [smem:[#allocation20_spill]] %s2131_s0 }
   0x2   :  { %2142 = sst [smem:[#allocation21_spill]] %s2133_s2 }
   0x3   :  { %11 = vsyncpa [#allocation3], 0 }
   0x4   :  { %13 = vsyncpa [#allocation3 + $0x1], 0 }
   0x5   :  { %14 = vsyncpa [#allocation6], 0 }
   0x6   :  { %16 = vsyncpa [#allocation6 + $0x1], 0 }
   0x7   :  { %17 = vsyncpa [#allocation9], 0 }
   0x8   :  { %18 = vsyncpa [#allocation12], 0 }
   0x9   :  { %19 = vsyncpa [#allocation4], 0  ;;  %s1735_s21 = smov 0   ;;  %s1737_s22 = smov 0  }
   0xa   :  { %s1739_s23 = smov 0   ;;  %s1741_s24 = smov 0  }
   0xb   :  { %s1743_s25 = smov 0   ;;  %s1745_s26 = smov 0  }
   0xc LB: > { %s1764_s27 = sadd.s32 4294967295, %s1684_s26   ;;  %p61_p0 = scmp.ne.s32.totalorder %s1668_s22, %s1664_s21  ;;  %s1684_s26 = sphi %s1745_s26, %s25_s26   ;;  %s1680_s25 = sphi %s1743_s25, %s2163_s25   ;;  %s1676_s24 = sphi %s1741_s24, %s2162_s24   ;;  %s1672_s23 = sphi %s1739_s23, %s2161_s23   ;;  %s1668_s22 = sphi %s1737_s22, %s2160_s22   ;;  %s1664_s21 = sphi %s1735_s21, %s2159_s21  }
   0xd   : > { %p2138_p1 = scmp.eq.s32.totalorder %s1764_s27, 0  ;;  %p1057_p2 = scmp.ge.s32.totalorder %s1684_s26, 1 }
   0xe   : > { %p212_p3 = scmp.lt.s32.totalorder %s1684_s26, 5  ;;  %s1686_s30 = smov [#allocation7]  }
   0xf   : > { %p1772_p4 = por %p2138_p1, %p61_p0  ;;  %s224_s7 = sshll.u32 %s1686_s30, 4  ;;  %s1780_s7 = int_to_ptr.vmem [resolvable:$true] %s224_s7 }
  0x10   : > { %p1776_p5 = pnand %p1057_p2, %p212_p3  ;;  %s1687_s9 = smov [#allocation8]  }
  0x11   : > { %s2143_s28 = scalar_select %p1772_p4, 1, 0 }
  0x12   : > { %s2144_s29 = scalar_select %p1776_p5, 1, 0 }
  0x13   : > { %p1325_p6 = pneg %p1776_p5  ;;  %s238_s10 = sshll.u32 %s1687_s9, 4  ;;  %s1790_s10 = int_to_ptr.vmem [resolvable:$true] %s238_s10 }
  0x14   : > { %s1688_s11 = smov [#allocation10]   ;;  %s2146_s2 = sld [smem:[#allocation21_spill]] }
  0x15   : > { %p1786_p7 = pnand %p1325_p6, %p2138_p1  ;;  %s1792_s12 = sshll.u32 %s1688_s11, 4  ;;  %s249_s12 = int_to_ptr.vmem [resolvable:$true] %s1792_s12 }
  0x17   : > { %p1802_p9 = pneg %p1786_p7 }
  0x1a   : > { %s1416_s15 = scalar_lea.hbm %s2146_s2, 256 }
  0x1b   : > { %p1417_p8 = scmp.ne.s32.totalorder %s2146_s2, %s1416_s15  ;;  %p1423_p12 = scmp.lt.u32.totalorder %s1416_s15, %s2146_s2 }
  0x1d   : > { %p1419_p10 = pnand %p1802_p9, %p1417_p8 }
  0x1f   : > { %p1420_p11 = pneg %p1419_p10 }
  0x21   : > { %p1425_p13 = pnand %p1423_p12, %p1420_p11 }
  0x23   : > { %1428 = shalt.err (!%p1425_p13)
}
  0x24   : > { %s1429_s21 = scalar_lea.vmem %s1780_s7, 256  ;;  %p1437_p6 = scmp.lt.s32.totalorder %s1780_s7, %s1780_s7 }
  0x25   : > { %p1430_p0 = scmp.ne.s32.totalorder %s1780_s7, %s1429_s21  ;;  %p1438_p1 = scmp.lt.s32.totalorder %s1429_s21, %s1429_s21 }
  0x27   : > { %p1432_p2 = pnand %p1430_p0, %p1802_p9  ;;  %p1439_p8 = por %p1438_p1, %p1437_p6 }
  0x29   : > { %p1433_p3 = pneg %p1432_p2 }
  0x2b   : > { %p1440_p10 = pnand %p1439_p8, %p1433_p3 }
  0x2d   : > { %1443 = shalt.err (!%p1440_p10)
}
  0x2e   : > { %s1689_s30 = smov 128   ;;  %s1690_s9 = smov 8  }
  0x2f   : > { %1328 = dma.hbm_to_vmem [thread:$0]  (!%p1786_p7), %s2146_s2, 256, %s1780_s7, [#allocation6], %s1689_s30, %s1689_s30, %s1690_s9  }
  0x30   : > { %s1444_s16 = scalar_lea.hbm %s2134_s3, 16 }
  0x31   : > { %p1445_p1 = scmp.ne.s32.totalorder %s2134_s3, %s1444_s16  ;;  %p1451_p13 = scmp.lt.u32.totalorder %s1444_s16, %s2134_s3 }
  0x33   : > { %p1447_p11 = pnand %p1445_p1, %p1802_p9 }
  0x35   : > { %p1448_p12 = pneg %p1447_p11 }
  0x37   : > { %p1453_p0 = pnand %p1451_p13, %p1448_p12 }
  0x39   : > { %1456 = shalt.err (!%p1453_p0)
}
  0x3a   : > { %s1457_s7 = scalar_lea.vmem %s1790_s10, 16  ;;  %s1464_s11 = scalar_lea.vmem %s1790_s10, 32 }
  0x3b   : > { %p1458_p2 = scmp.ne.s32.totalorder %s1790_s10, %s1457_s7  ;;  %p1465_p8 = scmp.lt.s32.totalorder %s1790_s10, %s1790_s10 }
  0x3c   : > { %p1466_p10 = scmp.lt.s32.totalorder %s1464_s11, %s1457_s7 }
  0x3d   : > { %p1460_p3 = pnand %p1458_p2, %p1802_p9 }
  0x3e   : > { %p1467_p1 = por %p1466_p10, %p1465_p8 }
  0x3f   : > { %p1461_p6 = pneg %p1460_p3 }
  0x41   : > { %p1468_p11 = pnand %p1467_p1, %p1461_p6 }
  0x43   : > { %1471 = shalt.err (!%p1468_p11)
}
  0x44   : > { %1331 = dma.hbm_to_vmem [thread:$0]  (!%p1786_p7), %s2134_s3, 16, %s1790_s10, [#allocation9]  }
  0x45   : > { %s1472_s17 = scalar_lea.hbm %s2135_s4, 512 }
  0x46   : > { %p1473_p12 = scmp.ne.s32.totalorder %s2135_s4, %s1472_s17  ;;  %p1479_p2 = scmp.lt.u32.totalorder %s1472_s17, %s2135_s4 }
  0x48   : > { %p1475_p13 = pnand %p1473_p12, %p1802_p9 }
  0x4a   : > { %p1476_p0 = pneg %p1475_p13 }
  0x4c   : > { %p1481_p3 = pnand %p1479_p2, %p1476_p0 }
  0x4e   : > { %1484 = shalt.err (!%p1481_p3)
}
  0x4f   : > { %s1485_s11 = scalar_lea.vmem %s249_s12, 512  ;;  %p1493_p1 = scmp.lt.s32.totalorder %s249_s12, %s249_s12 }
  0x50   : > { %p1486_p6 = scmp.ne.s32.totalorder %s249_s12, %s1485_s11  ;;  %p1494_p11 = scmp.lt.s32.totalorder %s1485_s11, %s1485_s11 }
  0x52   : > { %p1488_p8 = pnand %p1486_p6, %p1802_p9  ;;  %p1495_p4 = por %p1494_p11, %p1493_p1 }
  0x54   : > { %p1489_p10 = pneg %p1488_p8 }
  0x56   : > { %p1496_p5 = pnand %p1495_p4, %p1489_p10 }
  0x58   : > { %1499 = shalt.err (!%p1496_p5)
}
  0x59   : > { %1334 = dma.hbm_to_vmem [thread:$0]  (!%p1786_p7), %s2135_s4, 512, %s249_s12, [#allocation9], %s1689_s30, %s1689_s30, %s1690_s9  }
  0x5a   : > { %s1691_s14 = smov [#allocation11]   ;;  %s1500_s19 = scalar_lea.hbm %s2136_s5, 16 }
  0x5b   : > { %s262_s15 = sshll.u32 %s1691_s14, 4  ;;  %p1501_p4 = scmp.ne.s32.totalorder %s2136_s5, %s1500_s19  ;;  %s263_s15 = int_to_ptr.vmem [resolvable:$true] %s262_s15 }
  0x5c   : > { %p1507_p13 = scmp.lt.u32.totalorder %s1500_s19, %s2136_s5 }
  0x5d   : > { %p1503_p5 = pnand %p1501_p4, %p1802_p9 }
  0x5f   : > { %p1504_p12 = pneg %p1503_p5 }
  0x61   : > { %p1509_p0 = pnand %p1507_p13, %p1504_p12 }
  0x63   : > { %1512 = shalt.err (!%p1509_p0)
}
  0x64   : > { %s1513_s12 = scalar_lea.vmem %s263_s15, 16  ;;  %s1520_s10 = scalar_lea.vmem %s263_s15, 32 }
  0x65   : > { %p1514_p2 = scmp.ne.s32.totalorder %s263_s15, %s1513_s12  ;;  %p1521_p8 = scmp.lt.s32.totalorder %s263_s15, %s263_s15 }
  0x66   : > { %p1522_p10 = scmp.lt.s32.totalorder %s1520_s10, %s1513_s12 }
  0x67   : > { %p1516_p3 = pnand %p1514_p2, %p1802_p9 }
  0x68   : > { %p1523_p1 = por %p1522_p10, %p1521_p8 }
  0x69   : > { %p1517_p6 = pneg %p1516_p3 }
  0x6b   : > { %p1524_p11 = pnand %p1523_p1, %p1517_p6 }
  0x6d   : > { %1527 = shalt.err (!%p1524_p11)
}
  0x6e   : > { %1337 = dma.hbm_to_vmem [thread:$0]  (!%p1786_p7), %s2136_s5, 16, %s263_s15, [#allocation12]  }
  0x6f   : > { %s34_s18 = sadd.s32 1, %s1680_s25  ;;  %s48_s16 = sadd.s32 1, %s1672_s23 }
  0x70   : > { %p35_p9 = scmp.ge.s32.totalorder %s34_s18, 4  ;;  %p55_p4 = scmp.ne.s32.totalorder %s1672_s23, %s1668_s22 }
  0x71   : > { %p56_p5 = scmp.eq.s32.totalorder %s1684_s26, 0  ;;  %p1349_p12 = scmp.lt.s32.totalorder %s1684_s26, 4 }
  0x72   : > { %s2165_s18 = smov (%p35_p9, %s34_s18), 0  ;;  %s1899_s8 = sand.u32 1, %s1672_s23  }
  0x73   : > { %p57_p13 = por %p56_p5, %p55_p4  ;;  %s45_s17 = ssub.s32 %s1680_s25, %s2165_s18 }
  0x74   : > { %p46_p0 = scmp.eq.s32.totalorder %s45_s17, 0  ;;  %s1063_s19 = sshll.u32 %s1899_s8, 7 }
  0x75   : > { %s1114_s15 = sshll.u32 %s1680_s25, 11  ;;  %s2148_s0 = sld [smem:[#allocation20_spill]] }
  0x76   : > { %s1906_s20 = scalar_select %p46_p0, %s1672_s23, %s48_s16  }
  0x77   : > { %s277_s12 = scalar_lea.vmem [#allocation2], %s1063_s19  ;;  %p1917_p7 = pnand %p1349_p12, %p57_p13 }
  0x78   : > { %s286_s10 = sshll.u32 %s277_s12, 4  ;;  %s274_s16 = scalar_lea.sflag [#allocation3], %s1899_s8  ;;  %s1913_s10 = int_to_ptr.vmem [resolvable:$true] %s286_s10 }
  0x79   : > { %p1530_p3 = pneg %p1917_p7 }
  0x7b   : > { %s1911_s11 = scalar_lea.hbm %s2148_s0, %s1114_s15  ;;  %s1533_s21 = scalar_lea.hbm %s2148_s0, 8192 }
  0x7c   : > { %s1528_s17 = scalar_lea.hbm %s1911_s11, 2048  ;;  %p1534_p10 = scmp.lt.u32.totalorder %s1911_s11, %s2148_s0 }
  0x7d   : > { %p1529_p2 = scmp.ne.s32.totalorder %s1911_s11, %s1528_s17  ;;  %p1535_p1 = scmp.lt.u32.totalorder %s1533_s21, %s1528_s17 }
  0x7e   : > { %p1537_p9 = scmp.lt.u32.totalorder %s1528_s17, %s1911_s11 }
  0x7f   : > { %p1531_p6 = pnand %p1530_p3, %p1529_p2  ;;  %p1536_p11 = por %p1535_p1, %p1534_p10 }
  0x81   : > { %p1532_p8 = pneg %p1531_p6  ;;  %p1538_p4 = por %p1537_p9, %p1536_p11 }
  0x83   : > { %p1539_p5 = pnand %p1538_p4, %p1532_p8 }
  0x85   : > { %1542 = shalt.err (!%p1539_p5)
}
  0x86   : > { %s1543_s14 = scalar_lea.vmem %s1913_s10, 2048  ;;  %s1692_s19 = smov [#allocation2]  }
  0x87   : > { %p1544_p12 = scmp.ne.s32.totalorder %s1913_s10, %s1543_s14  ;;  %s1548_s15 = sshll.u32 %s1692_s19, 4  ;;  %s1549_s15 = int_to_ptr.vmem [resolvable:$false] %s1548_s15 }
  0x88   : > { %s1550_s7 = scalar_lea.vmem %s1549_s15, 4096  ;;  %p1551_p2 = scmp.lt.s32.totalorder %s1913_s10, %s1549_s15 }
  0x89   : > { %p1546_p13 = pnand %p1544_p12, %p1530_p3  ;;  %p1552_p6 = scmp.lt.s32.totalorder %s1550_s7, %s1543_s14 }
  0x8b   : > { %p1547_p0 = pneg %p1546_p13  ;;  %p1553_p10 = por %p1552_p6, %p1551_p2 }
  0x8d   : > { %p1554_p1 = pnand %p1553_p10, %p1547_p0 }
  0x8f   : > { %1557 = shalt.err (!%p1554_p1)
}
  0x90   : > { %1341 = dma.hbm_to_vmem [thread:$0]  (!%p1917_p7), %s1911_s11, 2048, %s1913_s10, %s274_s16, %s1689_s30, %s1689_s30, %s1690_s9  }
  0x91   : > { %s1066_s17 = sshll.u32 %s1680_s25, 4  ;;  %s299_s21 = scalar_lea.vmem [#allocation5], %s1899_s8 }
  0x92   : > { %s308_s14 = sshll.u32 %s299_s21, 4  ;;  %s1958_s15 = scalar_lea.hbm %s2132_s1, %s1066_s17  ;;  %s309_s14 = int_to_ptr.vmem [resolvable:$true] %s308_s14 }
  0x93   : > { %s2150_s7 = sand.u32 1, %s1684_s26   ;;  %s1558_s2 = scalar_lea.hbm %s1958_s15, 16 }
  0x94   : > { %s297_s0 = scalar_lea.sflag [#allocation6], %s2150_s7  ;;  %p1559_p8 = scmp.ne.s32.totalorder %s1958_s15, %s1558_s2 }
  0x95   : > { %s1563_s8 = scalar_lea.hbm %s2132_s1, 64  ;;  %p1564_p4 = scmp.lt.u32.totalorder %s1958_s15, %s2132_s1 }
  0x96   : > { %p1561_p11 = pnand %p1559_p8, %p1530_p3  ;;  %p1565_p5 = scmp.lt.u32.totalorder %s1563_s8, %s1558_s2 }
  0x97   : > { %p1567_p13 = scmp.lt.u32.totalorder %s1558_s2, %s1958_s15 }
  0x98   : > { %p1562_p9 = pneg %p1561_p11  ;;  %p1566_p12 = por %p1565_p5, %p1564_p4 }
  0x9a   : > { %p1568_p0 = por %p1567_p13, %p1566_p12 }
  0x9c   : > { %p1569_p2 = pnand %p1568_p0, %p1562_p9 }
  0x9e   : > { %1572 = shalt.err (!%p1569_p2)
}
  0x9f   : > { %s1573_s16 = scalar_lea.vmem %s309_s14, 16  ;;  %s1693_s17 = smov [#allocation5]  }
  0xa0   : > { %p1574_p6 = scmp.ne.s32.totalorder %s309_s14, %s1573_s16  ;;  %s1578_s21 = sshll.u32 %s1693_s17, 4  ;;  %s1579_s21 = int_to_ptr.vmem [resolvable:$false] %s1578_s21 }
  0xa1   : > { %s1580_s12 = scalar_lea.vmem %s1579_s21, 32  ;;  %p1581_p8 = scmp.lt.s32.totalorder %s309_s14, %s1579_s21 }
  0xa2   : > { %p1576_p10 = pnand %p1574_p6, %p1530_p3  ;;  %p1582_p11 = scmp.lt.s32.totalorder %s1580_s12, %s1573_s16 }
  0xa4   : > { %p1577_p1 = pneg %p1576_p10  ;;  %p1583_p4 = por %p1582_p11, %p1581_p8 }
  0xa6   : > { %p1584_p5 = pnand %p1583_p4, %p1577_p1 }
  0xa8   : > { %1587 = shalt.err (!%p1584_p5)
}
  0xa9   : > { %1344 = dma.hbm_to_vmem [thread:$0]  (!%p1917_p7), %s1958_s15, 16, %s309_s14, %s297_s0  }
  0xaa   : > { %p2151_p9 = scmp.ne.s32.totalorder %s2144_s29, 0 }
  0xab   : > { %s1984_s2 = sand.u32 (!%p2151_p9), 1, %s1668_s22   ;;  %p2152_p3 = scmp.ne.s32.totalorder (!%p2151_p9), %s2143_s28, 0 }
  0xac   : > { %317 = sbr.rel (%p2151_p9) target bundleno = 906 (0x38a), region = 44  ;;  %s1068_s19 = sshll.u32 (!%p2151_p9), %s1984_s2, 7 }
  0xad   : > { %s320_s7 = scalar_lea.sflag (!%p2151_p9), [#allocation3], %s1984_s2  ;;  %s1988_s30 = scalar_lea.vmem (!%p2151_p9), [#allocation2], %s1068_s19 }
  0xb3   : > { %1639 = dma.done.wait (%p2152_p3), %s320_s7, 2048  }
  0xb4   : > { %1641 = vsyncadd (%p2152_p3), %s320_s7, 4294965248  ;;  %s328_s0 = sand.u32 1, %s1764_s27   ;;  %s331_s13 = scalar_lea.vmem [#allocation5], %s1984_s2 }
  0xb5   : > { %s329_s29 = scalar_lea.sflag [#allocation6], %s328_s0 }
  0xb6   : > { %1643 = dma.done.wait (%p2152_p3), %s329_s29, 16  }
  0xb7   : > { %1645 = vsyncadd (%p2152_p3), %s329_s29, 4294967280  ;;  %p2153_p7 = scmp.eq.s32.totalorder %s1764_s27, 0 }
  0xb9   : > { %1647 = dma.done.wait (%p2153_p7), [#allocation6], 256   ;;  %p2154_p12 = pmov %p2153_p7 }
  0xba   : > { %p2155_p13 = pmov %p2153_p7 }
  0xbb   : > { %1649 = vsyncadd (%p2154_p12), [#allocation6], 4294967040 }
  0xbc   : > { %1651 = dma.done.wait (%p2155_p13), [#allocation9], 528   ;;  %p2156_p0 = pmov %p2153_p7 }
  0xbe   : > { %1653 = vsyncadd (%p2156_p0), [#allocation9], 4294966768  ;;  %p2157_p2 = pmov %p2156_p0 }
  0xbf   : > { %p2158_p6 = pmov %p2156_p0 }
  0xc0   : > { %1655 = dma.done.wait (%p2157_p2), [#allocation12], 16  }
  0xc1   : > { %1657 = vsyncadd (%p2158_p6), [#allocation12], 4294967280  ;;  %p1073_p10 = scmp.ne.s32.totalorder %s1676_s24, 0 }
  0xc2   : > { %vm384_vm0 = vcmask (!%p1073_p10), 261120   ;;  %v1694_v0 = vmov (!%p1073_p10), 0.0  }
  0xc3   : > { %383 = sbr.rel (%p1073_p10) target bundleno = 202 (0xca), region = 72  ;;  %385 = vst.msk [vmem:[#allocation13] sm:$0xff] (!%p1073_p10), %vm384_vm0, %v1694_v0 }
  0xca PF: > { %v402_v1 = vld [vmem:[#allocation7] sm:$0xff]  ;;  %v403_v2 = vld [vmem:[#allocation7 + $0x8] sm:$0xff]  ;;  %vm411_vm1 = vcmask 130048   ;;  %v621_v7 = vld [vmem:[#allocation10] sm:$0xff]  ;;  %vm632_vm2 = vcmask 261120   ;;  %vm1696_vm3 = vmmov 0  }
  0xcb   : > { %v386_v3 = vld [vmem:[%s1988_s30] sm:$0xff]  ;;  %v1265_v4 = vpack.c.bf16 %v403_v2, %v402_v1  ;;  %v387_v5 = vld [vmem:[%s1988_s30 + $0x8] sm:$0xff]  ;;  %v388_v6 = vld [vmem:[%s1988_s30 + $0x10] sm:$0xff]  ;;  %s1699_s24 = smov [#allocation13]   ;;  %p1354_p1 = scmp.eq.s32.totalorder %s1764_s27, 3 }
  0xcc   : > { %1174 = vmatprep.mubr.msk.f32.mxu0 %vm411_vm1, %v386_v3  ;;  %v622_v8 = vld [vmem:[#allocation10 + $0x8] sm:$0xff]  ;;  %v391_v12 = vld [vmem:[%s1988_s30 + $0x28] sm:$0xff]  ;;  %v392_v13 = vld [vmem:[%s1988_s30 + $0x30] sm:$0xff]  ;;  %s933_s28 = sshll.u32 %s1699_s24, 4  ;;  %s934_s28 = int_to_ptr.vmem [resolvable:$true] %s933_s28 }
  0xcd   : > { %1266 = vmatprep.subr.bf16.mxu0 %v1265_v4  ;;  %v1269_v9 = vpack.c.bf16 %v622_v8, %v621_v7  ;;  %v389_v10 = vld [vmem:[%s1988_s30 + $0x18] sm:$0xff]  ;;  %v390_v11 = vld [vmem:[%s1988_s30 + $0x20] sm:$0xff]  ;;  %v395_v16 = vld [vmem:[%s1988_s30 + $0x48] sm:$0xff]  ;;  %s1588_s14 = scalar_lea.vmem %s934_s28, 128  ;;  %p1595_p5 = scmp.lt.s32.totalorder %s934_s28, %s934_s28 }
  0xce   : > { %1268 = vmatpush3.bf16.msra.mxu0 %v1265_v4  ;;  %v393_v14 = vld [vmem:[%s1988_s30 + $0x38] sm:$0xff]  ;;  %v394_v15 = vld [vmem:[%s1988_s30 + $0x40] sm:$0xff]  ;;  %v396_v17 = vld [vmem:[%s1988_s30 + $0x50] sm:$0xff]  ;;  %p1589_p8 = scmp.ne.s32.totalorder %s934_s28, %s1588_s14  ;;  %p1596_p9 = scmp.lt.s32.totalorder %s1588_s14, %s1588_s14 }
  0xcf   : > { %1270 = vmatprep.subr.bf16.mxu1 %v1269_v9  ;;  %v397_v18 = vld [vmem:[%s1988_s30 + $0x58] sm:$0xff]  ;;  %v398_v19 = vld [vmem:[%s1988_s30 + $0x60] sm:$0xff]  ;;  %v399_v20 = vld [vmem:[%s1988_s30 + $0x68] sm:$0xff] }
  0xd0   : > { %1272 = vmatpush3.bf16.msra.mxu1 %v1269_v9  ;;  %v400_v21 = vld [vmem:[%s1988_s30 + $0x70] sm:$0xff]  ;;  %v401_v22 = vld [vmem:[%s1988_s30 + $0x78] sm:$0xff]  ;;  %v623_v23 = vld [vmem:[#allocation10 + $0x10] sm:$0xff]  ;;  %p1590_p11 = pnand %p1589_p8, %p1354_p1  ;;  %p1597_p3 = por %p1596_p9, %p1595_p5 }
  0xd1   : > { %1175 = vmatmul.mubr.msk.f32.vlgmr.msra.gmra.mrb[0].mxu0 %vm411_vm1, %v387_v5  ;;  %v624_v24 = vld [vmem:[#allocation10 + $0x18] sm:$0xff] }
  0xd2   : > { %1177 = vmatprep.mubr.msk.f32.mxu0 %vm411_vm1, %v388_v6  ;;  %v1273_v25 = vpack.c.bf16 %v624_v24, %v623_v23  ;;  %v1074_v26 = vld [vmem:[#allocation8] ss:$0 sm:$0xff]  ;;  %p1591_p4 = pneg %p1590_p11 }
  0xd4   : > { %1274 = vmatprep.subr.bf16.mxu1 %v1273_v25  ;;  %p1598_p7 = pnand %p1597_p3, %p1591_p4 }
  0xd5   : > { %1178 = vmatmul.mubr.msk.f32.gmra.mrb[2].mxu0 %vm411_vm1, %v389_v10  ;;  %1276 = vmatpush3.bf16.msra.mxu1 %v1273_v25 }
  0xd6   : > { %1180 = vmatprep.mubr.msk.f32.mxu0 %vm411_vm1, %v390_v11  ;;  %v1695_v11 = vmov 0.0|0.0  }
  0xd7   : > { %1277 = vmatprep.subr.bf16.mxu0 %v1695_v11 }
  0xd9   : > { %1181 = vmatmul.mubr.msk.f32.gmra.mrb[4].mxu0 %vm411_vm1, %v391_v12  ;;  %v1697_v12 = vmov 0.0  }
  0xda   : > { %1183 = vmatprep.mubr.msk.f32.mxu0 %vm411_vm1, %v392_v13  ;;  %v2062_v13 = vld [vmem:[#allocation11] ss:$0 sm:$0xff] }
  0xdd   : > { %1184 = vmatmul.mubr.msk.f32.gmra.mrb[6].mxu0 %vm411_vm1, %v393_v14 }
  0xde   : > { %1186 = vmatprep.mubr.msk.f32.mxu0 %vm411_vm1, %v394_v15 }
  0xe1   : > { %1187 = vmatmul.mubr.msk.f32.gmra.mrb[8].mxu0 %vm411_vm1, %v395_v16 }
  0xe2   : > { %1189 = vmatprep.mubr.msk.f32.mxu0 %vm411_vm1, %v396_v17 }
  0xe5   : > { %1190 = vmatmul.mubr.msk.f32.gmra.mrb[10].mxu0 %vm411_vm1, %v397_v18 }
  0xe6   : > { %1192 = vmatprep.mubr.msk.f32.mxu0 %vm411_vm1, %v398_v19 }
  0xe9   : > { %1193 = vmatmul.mubr.msk.f32.gmra.mrb[12].mxu0 %vm411_vm1, %v399_v20 }
  0xea   : > { %1195 = vmatprep.mubr.msk.f32.mxu0 %vm411_vm1, %v400_v21 }
  0xed   : > { %1196 = vmatmul.mubr.msk.f32.gmra.mrb[14].mxu0 %vm411_vm1, %v401_v22 }
  0xee   : > { %1262 = vmatprep.mubr.msk.f32.mxu0 %vm1696_vm3, %v1697_v12 }
 0x1a4   : > { %v1176_v27 = vpop.f32.mrb[0].mxu0 }
 0x1a5   : > { %v532_v28 = vadd.f32 %v1176_v27, %v1074_v26  ;;  %v526_v29 = vpop.f32.mrb[1].mxu0 }
 0x1a6   : > { %v527_v30 = vadd.f32 %v1074_v26, %v526_v29 }
 0x1a7   : > { %v606_v33 = vmax.f32 %v532_v28, 0.0 }
 0x1a8   : > { %v605_v31 = vmax.f32 %v527_v30, 0.0  ;;  %v1179_v32 = vpop.f32.mrb[2].mxu0 }
 0x1a9   : > { %v542_v34 = vadd.f32 %v1179_v32, %v1074_v26  ;;  %v536_v35 = vpop.f32.mrb[3].mxu0 }
 0x1aa   : > { %v537_v36 = vadd.f32 %v1074_v26, %v536_v35  ;;  %1206 = vmatprep.mubr.msk.f32.mxu1 %vm632_vm2, %v605_v31 }
 0x1ab   : > { %1207 = vmatmul.mubr.msk.f32.vlgmr.msra.gmra.mrb[0].mxu1 %vm632_vm2, %v606_v33  ;;  %v608_v39 = vmax.f32 %v542_v34, 0.0 }
 0x1ac   : > { %v607_v37 = vmax.f32 %v537_v36, 0.0  ;;  %v1182_v38 = vpop.f32.mrb[4].mxu0 }
 0x1ad   : > { %v552_v40 = vadd.f32 %v1182_v38, %v1074_v26  ;;  %v546_v41 = vpop.f32.mrb[5].mxu0 }
 0x1ae   : > { %v547_v42 = vadd.f32 %v1074_v26, %v546_v41  ;;  %1209 = vmatprep.mubr.msk.f32.mxu1 %vm632_vm2, %v607_v37 }
 0x1af   : > { %1210 = vmatmul.mubr.msk.f32.gmra.mrb[2].mxu1 %vm632_vm2, %v608_v39  ;;  %v610_v45 = vmax.f32 %v552_v40, 0.0 }
 0x1b0   : > { %v609_v43 = vmax.f32 %v547_v42, 0.0  ;;  %v1185_v44 = vpop.f32.mrb[6].mxu0 }
 0x1b1   : > { %v562_v46 = vadd.f32 %v1185_v44, %v1074_v26  ;;  %v556_v47 = vpop.f32.mrb[7].mxu0 }
 0x1b2   : > { %v557_v48 = vadd.f32 %v1074_v26, %v556_v47  ;;  %1212 = vmatprep.mubr.msk.f32.mxu1 %vm632_vm2, %v609_v43 }
 0x1b3   : > { %1213 = vmatmul.mubr.msk.f32.gmra.mrb[4].mxu1 %vm632_vm2, %v610_v45  ;;  %v612_v51 = vmax.f32 %v562_v46, 0.0 }
 0x1b4   : > { %v611_v49 = vmax.f32 %v557_v48, 0.0  ;;  %v1188_v50 = vpop.f32.mrb[8].mxu0 }
 0x1b5   : > { %v572_v52 = vadd.f32 %v1188_v50, %v1074_v26  ;;  %v566_v53 = vpop.f32.mrb[9].mxu0 }
 0x1b6   : > { %v567_v54 = vadd.f32 %v1074_v26, %v566_v53  ;;  %1215 = vmatprep.mubr.msk.f32.mxu1 %vm632_vm2, %v611_v49 }
 0x1b7   : > { %1216 = vmatmul.mubr.msk.f32.gmra.mrb[6].mxu1 %vm632_vm2, %v612_v51  ;;  %v614_v57 = vmax.f32 %v572_v52, 0.0 }
 0x1b8   : > { %v613_v55 = vmax.f32 %v567_v54, 0.0  ;;  %v1191_v56 = vpop.f32.mrb[10].mxu0 }
 0x1b9   : > { %v582_v58 = vadd.f32 %v1191_v56, %v1074_v26  ;;  %v576_v59 = vpop.f32.mrb[11].mxu0 }
 0x1ba   : > { %v577_v60 = vadd.f32 %v1074_v26, %v576_v59  ;;  %1218 = vmatprep.mubr.msk.f32.mxu1 %vm632_vm2, %v613_v55 }
 0x1bb   : > { %1219 = vmatmul.mubr.msk.f32.gmra.mrb[8].mxu1 %vm632_vm2, %v614_v57  ;;  %v616_v63 = vmax.f32 %v582_v58, 0.0 }
 0x1bc   : > { %v615_v61 = vmax.f32 %v577_v60, 0.0  ;;  %v1194_v62 = vpop.f32.mrb[12].mxu0 }
 0x1bd   : > { %v592_v0 = vadd.f32 %v1194_v62, %v1074_v26  ;;  %v586_v1 = vpop.f32.mrb[13].mxu0 }
 0x1be   : > { %v587_v2 = vadd.f32 %v1074_v26, %v586_v1  ;;  %1221 = vmatprep.mubr.msk.f32.mxu1 %vm632_vm2, %v615_v61 }
 0x1bf   : > { %1222 = vmatmul.mubr.msk.f32.gmra.mrb[10].mxu1 %vm632_vm2, %v616_v63  ;;  %v618_v5 = vmax.f32 %v592_v0, 0.0  ;;  %v843_v63 = vlaneseq }
 0x1c0   : > { %v617_v3 = vmax.f32 %v587_v2, 0.0  ;;  %v1197_v4 = vpop.f32.mrb[14].mxu0 }
 0x1c1   : > { %v602_v6 = vadd.f32 %v1197_v4, %v1074_v26  ;;  %v596_v7 = vpop.f32.mrb[15].mxu0 }
 0x1c2   : > { %v597_v8 = vadd.f32 %v1074_v26, %v596_v7  ;;  %1224 = vmatprep.mubr.msk.f32.mxu1 %vm632_vm2, %v617_v3  ;;  %v1108_v7 = vld [vmem:[%s331_s13] ss:$0 sm:$0xff] }
 0x1c3   : > { %1225 = vmatmul.mubr.msk.f32.gmra.mrb[12].mxu1 %vm632_vm2, %v618_v5  ;;  %v620_v10 = vmax.f32 %v602_v6, 0.0  ;;  %v844_v6 = vshrl.u32 %v843_v63, 7 }
 0x1c4   : > { %v619_v9 = vmax.f32 %v597_v8, 0.0 }
 0x1c5   : > { %vm849_vm4 = vcmp.eq.s32.totalorder %v844_v6, %v1108_v7 }
 0x1c6   : > { %1227 = vmatprep.mubr.msk.f32.mxu1 %vm632_vm2, %v619_v9  ;;  %v1698_v9 = vmov 1.0  }
 0x1c7   : > { %1228 = vmatmul.mubr.msk.f32.gmra.mrb[14].mxu1 %vm632_vm2, %v620_v10  ;;  %v851_v10 = vld [vmem:[#allocation13] sm:$0xff] }
 0x27e   : > { %v1208_v14 = vpop.f32.mrb[0].mxu1 }
 0x27f   : > { %v753_v15 = vadd.f32 %v1208_v14, %v2062_v13  ;;  %v747_v16 = vpop.f32.mrb[1].mxu1 }
 0x280   : > { %v748_v17 = vadd.f32 %v2062_v13, %v747_v16 }
 0x281   : > { %v827_v18 = vmax.f32 %v753_v15, 0.0 }
 0x282   : > { %v826_v19 = vmax.f32 %v748_v17, 0.0  ;;  %v1211_v20 = vpop.f32.mrb[2].mxu1 }
 0x283   : > { %v763_v21 = vadd.f32 %v1211_v20, %v2062_v13  ;;  %v757_v22 = vpop.f32.mrb[3].mxu1 }
 0x284   : > { %v1278_v23 = vpack.c.bf16 %v827_v18, %v826_v19  ;;  %v758_v24 = vadd.f32 %v2062_v13, %v757_v22 }
 0x285   : > { %v829_v25 = vmax.f32 %v763_v21, 0.0 }
 0x286   : > { %v828_v26 = vmax.f32 %v758_v24, 0.0  ;;  %v1214_v27 = vpop.f32.mrb[4].mxu1  ;;  %1279 = vmatpush3.bf16.msra.mxu0 %v1278_v23 }
 0x287   : > { %v773_v28 = vadd.f32 %v1214_v27, %v2062_v13  ;;  %v767_v29 = vpop.f32.mrb[5].mxu1  ;;  %1280 = vmatprep.subr.bf16.mxu0 %v1695_v11 }
 0x288   : > { %v1281_v30 = vpack.c.bf16 %v829_v25, %v828_v26  ;;  %v768_v31 = vadd.f32 %v2062_v13, %v767_v29 }
 0x289   : > { %v831_v32 = vmax.f32 %v773_v28, 0.0 }
 0x28a   : > { %v830_v33 = vmax.f32 %v768_v31, 0.0  ;;  %v1217_v34 = vpop.f32.mrb[6].mxu1  ;;  %1282 = vmatpush3.bf16.msra.mxu0 %v1281_v30 }
 0x28b   : > { %v783_v35 = vadd.f32 %v1217_v34, %v2062_v13  ;;  %v777_v36 = vpop.f32.mrb[7].mxu1  ;;  %1283 = vmatprep.subr.bf16.mxu0 %v1695_v11 }
 0x28c   : > { %v1284_v37 = vpack.c.bf16 %v831_v32, %v830_v33  ;;  %v778_v38 = vadd.f32 %v2062_v13, %v777_v36 }
 0x28d   : > { %v833_v39 = vmax.f32 %v783_v35, 0.0 }
 0x28e   : > { %v832_v40 = vmax.f32 %v778_v38, 0.0  ;;  %v1220_v41 = vpop.f32.mrb[8].mxu1  ;;  %1285 = vmatpush3.bf16.msra.mxu0 %v1284_v37 }
 0x28f   : > { %v793_v42 = vadd.f32 %v1220_v41, %v2062_v13  ;;  %v787_v43 = vpop.f32.mrb[9].mxu1  ;;  %1286 = vmatprep.subr.bf16.mxu0 %v1695_v11 }
 0x290   : > { %v1287_v44 = vpack.c.bf16 %v833_v39, %v832_v40  ;;  %v788_v45 = vadd.f32 %v2062_v13, %v787_v43 }
 0x291   : > { %v835_v46 = vmax.f32 %v793_v42, 0.0 }
 0x292   : > { %v834_v47 = vmax.f32 %v788_v45, 0.0  ;;  %v1223_v48 = vpop.f32.mrb[10].mxu1  ;;  %1288 = vmatpush3.bf16.msra.mxu0 %v1287_v44 }
 0x293   : > { %v803_v49 = vadd.f32 %v1223_v48, %v2062_v13  ;;  %v797_v50 = vpop.f32.mrb[11].mxu1  ;;  %1289 = vmatprep.subr.bf16.mxu0 %v1695_v11 }
 0x294   : > { %v1290_v51 = vpack.c.bf16 %v835_v46, %v834_v47  ;;  %v798_v52 = vadd.f32 %v2062_v13, %v797_v50 }
 0x295   : > { %v837_v53 = vmax.f32 %v803_v49, 0.0 }
 0x296   : > { %v836_v54 = vmax.f32 %v798_v52, 0.0  ;;  %v1226_v55 = vpop.f32.mrb[12].mxu1  ;;  %1291 = vmatpush3.bf16.msra.mxu0 %v1290_v51 }
 0x297   : > { %v813_v56 = vadd.f32 %v1226_v55, %v2062_v13  ;;  %v807_v57 = vpop.f32.mrb[13].mxu1  ;;  %1292 = vmatprep.subr.bf16.mxu0 %v1695_v11 }
 0x298   : > { %v1293_v58 = vpack.c.bf16 %v837_v53, %v836_v54  ;;  %v808_v59 = vadd.f32 %v2062_v13, %v807_v57 }
 0x299   : > { %v839_v60 = vmax.f32 %v813_v56, 0.0 }
 0x29a   : > { %v838_v61 = vmax.f32 %v808_v59, 0.0  ;;  %v1229_v62 = vpop.f32.mrb[14].mxu1  ;;  %1294 = vmatpush3.bf16.msra.mxu0 %v1293_v58 }
 0x29b   : > { %v823_v0 = vadd.f32 %v1229_v62, %v2062_v13  ;;  %v817_v1 = vpop.f32.mrb[15].mxu1  ;;  %1295 = vmatprep.subr.bf16.mxu0 %v1695_v11 }
 0x29c   : > { %v1296_v2 = vpack.c.bf16 %v839_v60, %v838_v61  ;;  %v818_v3 = vadd.f32 %v2062_v13, %v817_v1 }
 0x29d   : > { %v841_v4 = vmax.f32 %v823_v0, 0.0 }
 0x29e   : > { %v840_v5 = vmax.f32 %v818_v3, 0.0  ;;  %1297 = vmatpush3.bf16.msra.mxu0 %v1296_v2 }
 0x29f   : > { %1298 = vmatprep.subr.bf16.mxu0 %v1695_v11 }
 0x2a0   : > { %v1299_v8 = vpack.c.bf16 %v841_v4, %v840_v5 }
 0x2a2   : > { %1300 = vmatpush3.bf16.msra.mxu0 %v1299_v8 }
 0x2a5   : > { %1263 = vmatmul.mubr.msk.f32.vlgmr.msra.gmra.mrb[16].mxu0 %vm849_vm4, %v1698_v9 }
 0x378   : > { %v918_v12 = vpop.f32.mrb[16].mxu0 }
 0x379   : > { %v922_v13 = vadd.f32 %v918_v12, %v851_v10  ;;  %v1264_v14 = vpop.f32.mrb[17].mxu0 }
 0x37b   : > { %923 = vst.msk [vmem:[#allocation13] sm:$0xff] %vm632_vm2, %v922_v13 }
 0x37c   : > { %1601 = shalt.err (!%p1598_p7)
}
 0x37d   : > { %s1602_s8 = scalar_lea.hbm %s2137_s6, 128 }
 0x37e   : > { %p1603_p12 = scmp.ne.s32.totalorder %s2137_s6, %s1602_s8  ;;  %p1608_p2 = scmp.lt.u32.totalorder %s1602_s8, %s2137_s6 }
 0x380   : > { %p1604_p13 = pnand %p1603_p12, %p1354_p1 }
 0x382   : > { %p1605_p0 = pneg %p1604_p13 }
 0x384   : > { %p1610_p6 = pnand %p1608_p2, %p1605_p0 }
 0x386   : > { %1613 = shalt.err (!%p1610_p6)
}
 0x387   : > { %1322 = dma.vmem_to_hbm [thread:$0]  (%p1354_p1), %s934_s28, 128, %s2137_s6, [#allocation4]  }
 0x388   : > { %1659 = dma.done.wait (%p1354_p1), [#allocation4], 128  }
 0x389   : > { %1661 = vsyncadd (%p1354_p1), [#allocation4], 4294967168 }
 0x38a PF: > { %s25_s26 = sadd.s32 1, %s1684_s26   ;;  %s2159_s21 = smov %s1668_s22 }
 0x38b   : > { %p22_p10 = scmp.ge.s32.totalorder %s25_s26, 6   ;;  %s2160_s22 = smov %s1672_s23 }
 0x38c   : > { %s2161_s23 = smov %s1906_s20  ;;  %s2162_s24 = smov %s1680_s25 }
 0x38d   : > { %s2163_s25 = smov %s2165_s18  ;;  %24 = sbr.rel (!%p22_p10) target bundleno = 12 (0xc), region = 115 }
 0x394   :  { %946 = vsyncpa [#allocation3], 1 }
 0x395   :  { %948 = vsyncpa [#allocation3 + $0x1], 1 }
 0x396   :  { %949 = vsyncpa [#allocation6], 1 }
 0x397   :  { %951 = vsyncpa [#allocation6 + $0x1], 1 }
 0x398   :  { %952 = vsyncpa [#allocation9], 1 }
 0x399   :  { %953 = vsyncpa [#allocation12], 1 }
 0x39a   :  { %954 = vsyncpa [#allocation4], 1 }
 0x39b   :  { %956 = vsyncpa [#allocation4 + $0x1], 1 }

</bundles_post_ra>
